<compile_context>
chip_gen: v6e
topology: v6e:2x2x1
jax: 0.10.0
libtpu: 0.0.40
codegen_flags: <defaults>
</compile_context>

<pallas_src>
import functools

import jax
import jax.numpy as jnp
from jax.experimental import pallas as pl
from jax.experimental.pallas import tpu as pltpu

MARGIN = 0.2
EPS = 1e-5


def _encoder_cross_kernel(s_ref, dcol_ref, drow_ref, cs_ref, colpart_ref,
                          *, n_img, tm, last_partial):
    i = pl.program_id(0)

    s = s_ref[...]                                   # (TM, n_cap), input dtype
    d_col = dcol_ref[...]                            # (TM, 1)    diag - margin (rows)
    d_row = drow_ref[...]                            # (1, n_cap) diag - margin (cols)

    # ---- image-retrieval term: per-column sum of cost_im^4 over this stripe ----
    # Hinge in the input dtype (packed bf16 on v6e/v7x); square-square in f32.
    cost_im = jnp.maximum(s - d_row, 0.0).astype(jnp.float32)
    p4_im = cost_im * cost_im
    p4_im = p4_im * p4_im

    if last_partial:
        last = pl.num_programs(0) - 1

        @pl.when(i != last)
        def _full():
            colpart_ref[...] = jnp.sum(p4_im, axis=0, keepdims=True)[None]

        @pl.when(i == last)
        def _masked():
            # OOB rows of the partial trailing stripe read garbage; zero them
            # before the cross-row sum (mandatory for the column partials).
            row_ids = i * tm + jax.lax.broadcasted_iota(jnp.int32, (tm, 1), 0)
            valid = row_ids < n_img
            colpart_ref[...] = jnp.sum(
                jnp.where(valid, p4_im, 0.0), axis=0, keepdims=True)[None]
    else:
        colpart_ref[...] = jnp.sum(p4_im, axis=0, keepdims=True)[None]

    # ---- caption-retrieval term: per-row L4 norm, complete within the stripe ----
    # No mask needed: garbage rows only affect their own (OOB) output rows,
    # which Pallas drops when writing back the partial trailing block.
    cost_s = jnp.maximum(s - d_col, 0.0).astype(jnp.float32)
    p4_s = cost_s * cost_s
    p4_s = p4_s * p4_s
    row_sums = jnp.sum(p4_s, axis=1, keepdims=True)  # (TM, 1)
    cs_ref[...] = jnp.sqrt(jnp.sqrt(row_sums + EPS)).astype(cs_ref.dtype)


def _round_up(x, m):
    return pl.cdiv(x, m) * m


def encoder_cross(scores, n_img, n_cap, *, tm=None):
    """JAX/Pallas equivalent of EncoderCross.forward(scores, n_img, n_cap)."""
    # The PyTorch module implicitly requires a square score matrix
    # (diag().view(n_img, 1).expand_as(scores)); mirror that assumption.
    assert n_img == n_cap, "EncoderCross assumes n_img == n_cap"

    s = jnp.reshape(scores, (n_img, n_cap))          # keep input dtype (bf16 stays bf16)
    el_bytes = jnp.dtype(s.dtype).itemsize

    # Diagonal (O(N) in XLA, trivially cheap) with MARGIN folded in once, kept
    # in the input dtype so the in-kernel hinge runs in native (packed) dtype.
    diag = jnp.diagonal(s).astype(jnp.float32) - MARGIN
    d_col = diag.reshape(n_img, 1).astype(s.dtype)
    d_row = diag.reshape(1, n_cap).astype(s.dtype)

    # Row-stripe height: ~4 MiB of HBM bytes per stripe (dtype-aware) so the
    # per-grid-step overhead (~0.35 us) is amortized and the DMA stays near the
    # HBM roofline.  No artificial 1024-row cap.
    if tm is None:
        budget_bytes = 4 * 1024 * 1024
        tm = budget_bytes // max(1, n_cap * el_bytes)
    tm = max(8, (tm // 8) * 8)
    tm = min(tm, _round_up(n_img, 8))

    n_stripes = pl.cdiv(n_img, tm)
    last_partial = (n_img % tm) != 0

    # Triple-buffer the score stripes when the grid is long enough; hides DMA
    # issue latency on fast-HBM chips (v7x).  Guarded so older jax still runs.
    score_kwargs = {}
    if n_stripes >= 3 and hasattr(pl, "Buffered"):
        score_kwargs["pipeline_mode"] = pl.Buffered(3)
    score_spec = pl.BlockSpec((tm, n_cap), lambda i: (i, 0), **score_kwargs)

    kernel = functools.partial(
        _encoder_cross_kernel, n_img=n_img, tm=tm, last_partial=last_partial)

    cs_rows, col_part = pl.pallas_call(
        kernel,
        out_shape=(
            jax.ShapeDtypeStruct((n_img, 1), jnp.float32),            # per-row cs terms
            jax.ShapeDtypeStruct((n_stripes, 1, n_cap), jnp.float32),  # per-stripe column partials
        ),
        grid_spec=pltpu.PrefetchScalarGridSpec(
            num_scalar_prefetch=0,
            grid=(n_stripes,),
            in_specs=[
                score_spec,                                       # score row stripe
                pl.BlockSpec((tm, 1), lambda i: (i, 0)),          # (diag - margin) rows
                pl.BlockSpec((1, n_cap), lambda i: (0, 0)),       # (diag - margin) cols
            ],
            out_specs=[
                pl.BlockSpec((tm, 1), lambda i: (i, 0)),
                pl.BlockSpec((1, 1, n_cap), lambda i: (i, 0, 0)),
            ],
        ),
        compiler_params=pltpu.CompilerParams(
            # No cross-step dependence -> fully parallel; v7x shards the
            # stripes across both TensorCores (no effect on v5e/v6e: 1 TC).
            dimension_semantics=("parallel",),
            # Explicit budget: triple-buffered stripe + f32 temporaries fit
            # comfortably under every chip's physical VMEM (64 MiB/TC on v7x).
            vmem_limit_bytes=48 * 1024 * 1024,
        ),
        cost_estimate=pl.CostEstimate(
            flops=10 * n_img * n_cap,
            transcendentals=2 * n_img,
            bytes_accessed=n_img * n_cap * el_bytes
            + 4 * (2 * n_img + (n_stripes + 2) * n_cap),
        ),
    )(s, d_col, d_row)

    # Tiny cross-stripe reduction + finalize of the image-retrieval term in XLA
    # (n_stripes x n_cap elements, negligible vs. the N x N read).
    col_sums = jnp.sum(col_part, axis=(0, 1))                    # (n_cap,)
    ci = jnp.sqrt(jnp.sqrt(col_sums + EPS))
    return jnp.sum(cs_rows) + jnp.sum(ci)


def encoder_cross_ref(scores, n_img, n_cap):
    """Pure-JAX reference for verification (mirrors the PyTorch module)."""
    s = jnp.reshape(scores, (n_img, n_cap)).astype(jnp.float32)
    diag = jnp.diagonal(s).reshape(n_img, 1)
    cost_s = jnp.maximum(MARGIN + s - diag, 0.0)
    cost_im = jnp.maximum(MARGIN + s - diag.T, 0.0)
    cs = jnp.sqrt(jnp.sqrt(jnp.sum(cost_s ** 4, axis=1) + EPS))
    ci = jnp.sqrt(jnp.sqrt(jnp.sum(cost_im ** 4, axis=0) + EPS))
    return jnp.sum(cs) + jnp.sum(ci)


if __name__ == "__main__":
    key = jax.random.PRNGKey(0)
    k1, k2, k3, k4 = jax.random.split(key, 4)

    # Case 1: small square batch, single full stripe.
    n = 8
    scores1 = jax.random.normal(k1, (n * n,), dtype=jnp.float32)
    out1 = jax.block_until_ready(encoder_cross(scores1, n, n))
    ref1 = jax.block_until_ready(encoder_cross_ref(scores1, n, n))
    assert jnp.allclose(out1, ref1, rtol=1e-5, atol=1e-5), (out1, ref1)

    # Case 2: n not a multiple of 8 -> single partial stripe (masked path, no pad).
    n = 20
    scores2 = jax.random.normal(k2, (n * n,), dtype=jnp.float32)
    out2 = jax.block_until_ready(encoder_cross(scores2, n, n))
    ref2 = jax.block_until_ready(encoder_cross_ref(scores2, n, n))
    assert jnp.allclose(out2, ref2, rtol=1e-5, atol=1e-5), (out2, ref2)

    # Case 3: forced small stripe -> multi-step parallel grid, Buffered(3)
    # score stripes, partial trailing stripe with in-kernel row mask.
    n = 40
    scores3 = jax.random.normal(k3, (n * n,), dtype=jnp.float32)
    out3 = jax.block_until_ready(encoder_cross(scores3, n, n, tm=16))
    ref3 = jax.block_until_ready(encoder_cross_ref(scores3, n, n))
    assert jnp.allclose(out3, ref3, rtol=1e-5, atol=1e-5), (out3, ref3)

    # Case 4: bf16 scores -> hinge stage in bf16 (packed VALU), f32 reductions.
    n = 24
    scores4 = jax.random.normal(k4, (n * n,), dtype=jnp.float32).astype(jnp.bfloat16)
    out4 = jax.block_until_ready(encoder_cross(scores4, n, n, tm=8))
    ref4 = jax.block_until_ready(encoder_cross_ref(scores4, n, n))
    assert jnp.allclose(out4, ref4, rtol=5e-2, atol=5e-2), (out4, ref4)

    print("KERNEL_OK")
</pallas_src>

<mosaic_0001>
module attributes {stable_mosaic.version = 11 : i64} {
  func.func @_encoder_cross_kernel(%arg0: i32, %arg1: memref<8x8xf32, #tpu.memory_space<vmem>>, %arg2: memref<8x1xf32, #tpu.memory_space<vmem>>, %arg3: memref<1x8xf32, #tpu.memory_space<vmem>>, %arg4: memref<8x1xf32, #tpu.memory_space<vmem>>, %arg5: memref<1x1x8xf32, #tpu.memory_space<vmem>>) attributes {dimension_semantics = [#tpu.dimension_semantics<parallel>], iteration_bounds = array<i64: 1>, scalar_prefetch = 0 : i64, scratch_operands = 0 : i64, tpu.core_type = #tpu.core_type<tc>, window_params = [{transform_indices = @transform_0, window_bounds = array<i64: 8, 8>}, {transform_indices = @transform_1, window_bounds = array<i64: 8, 1>}, {pipeline_mode = #tpu.pipeline_mode<synchronous>, transform_indices = @transform_2, window_bounds = array<i64: 1, 8>}, {transform_indices = @transform_3, window_bounds = array<i64: 8, 1>}, {transform_indices = @transform_4, window_bounds = array<i64: 1, 1, 8>}]} {
    %c0 = arith.constant 0 : index
    %c0_0 = arith.constant 0 : index
    %0 = vector.load %arg1[%c0, %c0_0] : memref<8x8xf32, #tpu.memory_space<vmem>>, vector<8x8xf32>
    %c0_1 = arith.constant 0 : index
    %c0_2 = arith.constant 0 : index
    %1 = vector.load %arg2[%c0_1, %c0_2] : memref<8x1xf32, #tpu.memory_space<vmem>>, vector<8x1xf32>
    %c0_3 = arith.constant 0 : index
    %c0_4 = arith.constant 0 : index
    %2 = vector.load %arg3[%c0_3, %c0_4] : memref<1x8xf32, #tpu.memory_space<vmem>>, vector<1x8xf32>
    %3 = vector.broadcast %2 : vector<1x8xf32> to vector<8x8xf32>
    %4 = arith.subf %0, %3 : vector<8x8xf32>
    %cst = arith.constant 0.000000e+00 : f32
    %5 = vector.broadcast %cst : f32 to vector<8x8xf32>
    %6 = arith.maximumf %4, %5 : vector<8x8xf32>
    %7 = arith.mulf %6, %6 : vector<8x8xf32>
    %8 = arith.mulf %7, %7 : vector<8x8xf32>
    %cst_5 = arith.constant dense<0.000000e+00> : vector<8xf32>
    %9 = vector.multi_reduction <add>, %8, %cst_5 [0] : vector<8x8xf32> to vector<8xf32>
    %10 = vector.shape_cast %9 : vector<8xf32> to vector<1x8xf32>
    %11 = vector.shape_cast %10 : vector<1x8xf32> to vector<1x1x8xf32>
    %c0_6 = arith.constant 0 : index
    %c0_7 = arith.constant 0 : index
    %c0_8 = arith.constant 0 : index
    %12 = vector.load %arg5[%c0_6, %c0_7, %c0_8] : memref<1x1x8xf32, #tpu.memory_space<vmem>>, vector<1x1x8xf32>
    tpu.vector_store %arg5[%c0_6, %c0_7, %c0_8], %11 {strides = array<i32>} : memref<1x1x8xf32, #tpu.memory_space<vmem>>, vector<1x1x8xf32>,
    %13 = vector.broadcast %1 : vector<8x1xf32> to vector<8x8xf32>
    %14 = arith.subf %0, %13 : vector<8x8xf32>
    %cst_9 = arith.constant 0.000000e+00 : f32
    %15 = vector.broadcast %cst_9 : f32 to vector<8x8xf32>
    %16 = arith.maximumf %14, %15 : vector<8x8xf32>
    %17 = arith.mulf %16, %16 : vector<8x8xf32>
    %18 = arith.mulf %17, %17 : vector<8x8xf32>
    %cst_10 = arith.constant dense<0.000000e+00> : vector<8xf32>
    %19 = vector.multi_reduction <add>, %18, %cst_10 [1] : vector<8x8xf32> to vector<8xf32>
    %20 = vector.shape_cast %19 : vector<8xf32> to vector<8x1xf32>
    %cst_11 = arith.constant 9.99999974E-6 : f32
    %21 = vector.broadcast %cst_11 : f32 to vector<8x1xf32>
    %22 = arith.addf %20, %21 : vector<8x1xf32>
    %23 = math.sqrt %22 : vector<8x1xf32>
    %24 = math.sqrt %23 : vector<8x1xf32>
    %c0_12 = arith.constant 0 : index
    %c0_13 = arith.constant 0 : index
    %25 = vector.load %arg4[%c0_12, %c0_13] : memref<8x1xf32, #tpu.memory_space<vmem>>, vector<8x1xf32>
    tpu.vector_store %arg4[%c0_12, %c0_13], %24 {strides = array<i32>} : memref<8x1xf32, #tpu.memory_space<vmem>>, vector<8x1xf32>,
    return
  }
  func.func @transform_0(%arg0: i32) -> (i32, i32) {
    %c0_i32 = arith.constant 0 : i32
    %c0_i32_0 = arith.constant 0 : i32
    return %arg0, %c0_i32 : i32, i32
  }
  func.func @transform_1(%arg0: i32) -> (i32, i32) {
    %c0_i32 = arith.constant 0 : i32
    %c0_i32_0 = arith.constant 0 : i32
    return %arg0, %c0_i32 : i32, i32
  }
  func.func @transform_2(%arg0: i32) -> (i32, i32) {
    %c0_i32 = arith.constant 0 : i32
    %c0_i32_0 = arith.constant 0 : i32
    %c0_i32_1 = arith.constant 0 : i32
    return %c0_i32, %c0_i32_0 : i32, i32
  }
  func.func @transform_3(%arg0: i32) -> (i32, i32) {
    %c0_i32 = arith.constant 0 : i32
    %c0_i32_0 = arith.constant 0 : i32
    return %arg0, %c0_i32 : i32, i32
  }
  func.func @transform_4(%arg0: i32) -> (i32, i32, i32) {
    %c0_i32 = arith.constant 0 : i32
    %c0_i32_0 = arith.constant 0 : i32
    %c0_i32_1 = arith.constant 0 : i32
    return %arg0, %c0_i32, %c0_i32_0 : i32, i32, i32
  }
}

</mosaic_0001>

<bundles_post_ra>
// kernel: tpu_custom_call.1
= control target key start
LH: loop header
LB: loop body
LE: loop exit
PB: predicated region body
PF: predicated region fallthrough
CT: control target
= control target key end

     0   :  { %v117_v1 = vmov 0   ;;  %s159_s0 = inlined_call_operand.vmem [shape: f32[8,8], index: 0, kind: input, shape index: {}]   ;;  %s160_s1 = inlined_call_operand.vmem [shape: f32[8,1], index: 1, kind: input, shape index: {}]   ;;  %s161_s2 = inlined_call_operand.vmem [shape: f32[1,8], index: 2, kind: input, shape index: {}]   ;;  %s162_s3 = inlined_call_operand.vmem [shape: f32[8,1], index: 3, kind: output, shape index: {0}]   ;;  %s163_s4 = inlined_call_operand.hbm [shape: f32[1,1,8], index: 4, kind: output, shape index: {1}]  }
   0x1   :  { %v18_v0 = vld [vmem:[%s160_s1] sm:$0xff]  ;;  %90 = vset.pattern.permute.xlu0 %v117_v1 }
   0x2   :  { %10 = vsyncpa [#allocation3], 0  ;;  %42 = vperm.xlu0 %90, %v18_v0   ;;  %v17_v2 = vld [vmem:[%s159_s0] sm:$0xff]  ;;  %vm30_vm0 = vcmask 64512   ;;  %vm38_vm1 = vcmask 57344   ;;  %s118_s0 = smov [#allocation2]  }
   0x3   :  { %v87_v9 = vld [vmem:[%s161_s2] ss:$0 sm:$0xff]  ;;  %s77_s1 = sshll.u32 %s118_s0, 4  ;;  %s78_s1 = int_to_ptr.vmem [resolvable:$true] %s77_s1 }
   0x4   :  { %v26_v10 = vsub.f32 %v17_v2, %v87_v9  ;;  %s95_s21 = scalar_lea.vmem %s78_s1, 16  ;;  %s99_s22 = scalar_lea.vmem %s78_s1, 32 }
   0x5   :  { %p96_p0 = scmp.ne.s32.totalorder %s78_s1, %s95_s21  ;;  %p100_p1 = scmp.lt.s32.totalorder %s78_s1, %s78_s1 }
   0x6   :  { %v27_v11 = vmax.f32 %v26_v10, 0.0  ;;  %p101_p2 = scmp.lt.s32.totalorder %s99_s22, %s95_s21 }
   0x8   :  { %v28_v12 = vmul.f32 %v27_v11, %v27_v11  ;;  %p102_p3 = por %p101_p2, %p100_p1 }
   0xa   :  { %v29_v13 = vmul.f32 %v28_v12, %v28_v12  ;;  %p103_p4 = pnand %p102_p3, %p96_p0 }
   0xc   :  { %v31_v14 = vsel %vm30_vm0, %v29_v13, 0.0 }
   0xd   :  { %v32_v15 = vrot.slane %v31_v14, 4 }
   0xf   :  { %v33_v16 = vadd.f32 %v32_v15, %v31_v14 }
  0x11   :  { %v34_v17 = vrot.slane %v33_v16, 2 }
  0x13   :  { %v35_v18 = vadd.f32 %v34_v17, %v33_v16 }
  0x15   :  { %v36_v19 = vrot.slane %v35_v18, 1 }
  0x17   :  { %v37_v20 = vadd.f32 %v36_v19, %v35_v18 }
  0x19   :  { %39 = vst.msk [vmem:[#allocation2] sm:$0x1] %vm38_vm1, %v37_v20 }
  0x7d   :  { %v43_v3 = vpop.permute.xlu0 %42 }
  0x7e   :  { %v45_v4 = vsub.f32 %v17_v2, %v43_v3 }
  0x80   :  { %v46_v5 = vmax.f32 %v45_v4, 0.0 }
  0x82   :  { %v47_v6 = vmul.f32 %v46_v5, %v46_v5 }
  0x84   :  { %v48_v7 = vmul.f32 %v47_v6, %v47_v6 }
  0x86   :  { %v49_v8 = vsel %vm30_vm0, %v48_v7, 0.0 }
  0x87   :  { %50 = vadd.xlane.f32.xlu0 %v49_v8 }
  0x88   :  { %106 = shalt.err (!%p103_p4)
}
  0x89   :  { %80 = dma.vmem_to_hbm [thread:$0]  %s78_s1, 16, %s163_s4, [#allocation3]   ;;  %vm67_vm4 = vcmask 7168  }
 0x110   :  { %v51_v21 = vpop.xlane.xlu0 %50 }
 0x111   :  { %v52_v22 = vadd.f32 1e-05, %v51_v21 }
 0x113   :  { %91 = vrsqrt.f32 %v52_v22  ;;  %vm55_vm2 = vcmp.eq.f32.partialorder %v52_v22, inf  ;;  %v58_v25 = vand.u32 2147483648, %v52_v22  ;;  %vm57_vm3 = vcmp.eq.f32.partialorder %v52_v22, 0.0 }
 0x120   :  { %v92_v23 = vpop.eup %91 }
 0x121   :  { %v54_v24 = vmul.f32 %v92_v23, %v52_v22 }
 0x123   :  { %v56_v26 = vsel %vm55_vm2, %v52_v22, %v54_v24 }
 0x124   :  { %v59_v27 = vsel %vm57_vm3, %v58_v25, %v56_v26 }
 0x125   :  { %93 = vrsqrt.f32 %v59_v27  ;;  %vm62_vm5 = vcmp.eq.f32.partialorder %v59_v27, inf  ;;  %v65_v30 = vand.u32 2147483648, %v59_v27  ;;  %vm64_vm6 = vcmp.eq.f32.partialorder %v59_v27, 0.0 }
 0x132   :  { %v94_v28 = vpop.eup %93 }
 0x133   :  { %v61_v29 = vmul.f32 %v94_v28, %v59_v27 }
 0x135   :  { %v63_v31 = vsel %vm62_vm5, %v59_v27, %v61_v29 }
 0x136   :  { %v66_v32 = vsel %vm64_vm6, %v65_v30, %v63_v31 }
 0x137   :  { %68 = vst.msk [vmem:[%s162_s3] sm:$0xff] %vm67_vm4, %v66_v32 }
 0x138   :  { %115 = dma.done.wait [#allocation3], 16  }
 0x139   :  { %116 = vsyncadd [#allocation3], 4294967280 }
 0x13a   :  { %86 = vsyncpa [#allocation3], 1 }

</bundles_post_ra>
